<compile_context>
chip_gen: v5e
topology: v5e:2x2
jax: 0.10.0
libtpu: 0.0.40
codegen_flags: <defaults>
</compile_context>

<pallas_src>
import jax
import jax.numpy as jnp
from jax.experimental import pallas as pl
from jax.experimental.pallas import tpu as pltpu

LANE = 128


def fusion_head_kernel(text_ref, img_ref, w1_ref, b1_ref, w2_ref, b2_ref,
                       out_ref, comb_ref):
    """One batch-tile of the fusion head.

    text_ref : [TB, S, Ht]   bf16  last hidden state of the text backbone
    img_ref  : [TB, Hi]      bf16  pooled ViT image embedding
    w1_ref   : [Ht+Hi, F]    bf16  fusion_proj weight (pre-transposed [in, out])
    b1_ref   : [1, F]        f32
    w2_ref   : [F, Np]       bf16  classifier weight, lane-padded to Np=128
    b2_ref   : [1, Np]       f32   lane-padded
    out_ref  : [TB, Np]      f32   lane-padded logits
    comb_ref : [TB, Ht+Hi]   bf16  VMEM scratch for the concat
    """
    ht = text_ref.shape[2]
    hi = img_ref.shape[1]

    # Mean pool over the sequence axis (dim=1); accumulate in f32 on the VPU.
    text_embeds = jnp.mean(text_ref[...].astype(jnp.float32), axis=1)  # [TB, Ht]

    # In-kernel concat: two static, lane-aligned stores into one scratch buffer
    # so the fusion projection is a single dense-K MXU pass.
    comb_ref[:, :ht] = text_embeds.astype(jnp.bfloat16)
    comb_ref[:, ht:ht + hi] = img_ref[...]

    z = jnp.dot(comb_ref[...], w1_ref[...],
                preferred_element_type=jnp.float32) + b1_ref[...]       # [TB, F]
    fused = jnp.maximum(z, 0.0)                                         # ReLU

    logits = jnp.dot(fused.astype(jnp.bfloat16), w2_ref[...],
                     preferred_element_type=jnp.float32) + b2_ref[...]  # [TB, Np]
    out_ref[...] = logits


def multimodal_classifier_forward(text_hidden, image_embeds, w1, b1, w2, b2,
                                  block_b=128):
    """text_hidden [B,S,Ht] f32, image_embeds [B,Hi] f32,
    w1 [Ht+Hi,F], b1 [1,F], w2 [F,num_labels], b2 [1,num_labels]."""
    B, S, Ht = text_hidden.shape
    Hi = image_embeds.shape[1]
    F = w1.shape[1]
    num_labels = w2.shape[1]

    # Lane-pad the tiny classifier output (num_labels=2) to a full 128-lane
    # width: dense second MXU pass + unmasked stores. Extra columns are zeros.
    n_pad = ((num_labels + LANE - 1) // LANE) * LANE
    w2_p = jnp.zeros((F, n_pad), jnp.float32).at[:, :num_labels].set(
        w2.astype(jnp.float32))
    b2_p = jnp.zeros((1, n_pad), jnp.float32).at[:, :num_labels].set(
        b2.astype(jnp.float32))

    # bf16 at the boundary: halves HBM traffic for the dominant text stream and
    # feeds the MXU natively; accumulation stays f32 inside the kernel.
    text_bf = text_hidden.astype(jnp.bfloat16)
    img_bf = image_embeds.astype(jnp.bfloat16)
    w1_bf = w1.astype(jnp.bfloat16)
    w2_bf = w2_p.astype(jnp.bfloat16)
    b1_f32 = b1.astype(jnp.float32)

    tb = min(block_b, B)
    grid = (pl.cdiv(B, tb),)

    out_padded = pl.pallas_call(
        fusion_head_kernel,
        out_shape=jax.ShapeDtypeStruct((B, n_pad), jnp.float32),
        grid_spec=pltpu.PrefetchScalarGridSpec(
            num_scalar_prefetch=0,
            grid=grid,
            in_specs=[
                pl.BlockSpec((tb, S, Ht), lambda i: (i, 0, 0)),   # text stream
                pl.BlockSpec((tb, Hi), lambda i: (i, 0)),          # image stream
                pl.BlockSpec((Ht + Hi, F), lambda i: (0, 0)),      # W1 (pinned)
                pl.BlockSpec((1, F), lambda i: (0, 0)),            # b1 (pinned)
                pl.BlockSpec((F, n_pad), lambda i: (0, 0)),        # W2 (pinned)
                pl.BlockSpec((1, n_pad), lambda i: (0, 0)),        # b2 (pinned)
            ],
            out_specs=pl.BlockSpec((tb, n_pad), lambda i: (i, 0)),
            scratch_shapes=[pltpu.VMEM((tb, Ht + Hi), jnp.bfloat16)],
        ),
        compiler_params=pltpu.CompilerParams(
            dimension_semantics=("parallel",)),
    )(text_bf, img_bf, w1_bf, b1_f32, w2_bf, b2_p)

    return out_padded[:, :num_labels]


if __name__ == "__main__":
    # Small shapes consistent with the module's forward:
    #   text hidden Ht, image hidden Hi, fusion_hidden_dim F, num_labels 2.
    B, S = 8, 16
    Ht, Hi = 128, 128
    F = 256
    NUM_LABELS = 2

    key = jax.random.PRNGKey(0)
    k_txt, k_img, k_w1, k_b1, k_w2, k_b2 = jax.random.split(key, 6)

    # "Backbone outputs" (stand-ins for text_model / image_model features).
    text_hidden = jax.random.normal(k_txt, (B, S, Ht), dtype=jnp.float32)
    image_embeds = jax.random.normal(k_img, (B, Hi), dtype=jnp.float32)

    # Fusion-head parameters (nn.Linear(Ht+Hi, F), nn.Linear(F, 2)),
    # stored pre-transposed as [in, out].
    w1 = jax.random.normal(k_w1, (Ht + Hi, F), dtype=jnp.float32) * 0.02
    b1 = jax.random.normal(k_b1, (1, F), dtype=jnp.float32) * 0.02
    w2 = jax.random.normal(k_w2, (F, NUM_LABELS), dtype=jnp.float32) * 0.02
    b2 = jax.random.normal(k_b2, (1, NUM_LABELS), dtype=jnp.float32) * 0.02

    logits = multimodal_classifier_forward(
        text_hidden, image_embeds, w1, b1, w2, b2)
    logits = jax.block_until_ready(logits)

    # Pure-JAX f32 reference (kernel uses bf16 inputs -> looser tolerance).
    text_embeds_ref = jnp.mean(text_hidden, axis=1)
    combined_ref = jnp.concatenate([text_embeds_ref, image_embeds], axis=1)
    fused_ref = jnp.maximum(combined_ref @ w1 + b1, 0.0)
    logits_ref = fused_ref @ w2 + b2

    assert logits.shape == (B, NUM_LABELS)
    assert jnp.allclose(logits, logits_ref, atol=1e-2, rtol=1e-2), (
        float(jnp.max(jnp.abs(logits - logits_ref))))

    print("KERNEL_OK")
</pallas_src>

<mosaic_0001>
module attributes {stable_mosaic.version = 11 : i64} {
  func.func @fusion_head_kernel(%arg0: i32, %arg1: memref<8x16x128xbf16, #tpu.memory_space<vmem>>, %arg2: memref<8x128xbf16, #tpu.memory_space<vmem>>, %arg3: memref<256x256xbf16, #tpu.memory_space<vmem>>, %arg4: memref<1x256xf32, #tpu.memory_space<vmem>>, %arg5: memref<256x128xbf16, #tpu.memory_space<vmem>>, %arg6: memref<1x128xf32, #tpu.memory_space<vmem>>, %arg7: memref<8x128xf32, #tpu.memory_space<vmem>>, %arg8: memref<8x256xbf16, #tpu.memory_space<vmem>>) attributes {dimension_semantics = [#tpu.dimension_semantics<parallel>], iteration_bounds = array<i64: 1>, scalar_prefetch = 0 : i64, scratch_operands = 1 : i64, tpu.core_type = #tpu.core_type<tc>, window_params = [{transform_indices = @transform_0, window_bounds = array<i64: 8, 16, 128>}, {transform_indices = @transform_1, window_bounds = array<i64: 8, 128>}, {pipeline_mode = #tpu.pipeline_mode<synchronous>, transform_indices = @transform_2, window_bounds = array<i64: 256, 256>}, {pipeline_mode = #tpu.pipeline_mode<synchronous>, transform_indices = @transform_3, window_bounds = array<i64: 1, 256>}, {pipeline_mode = #tpu.pipeline_mode<synchronous>, transform_indices = @transform_4, window_bounds = array<i64: 256, 128>}, {pipeline_mode = #tpu.pipeline_mode<synchronous>, transform_indices = @transform_5, window_bounds = array<i64: 1, 128>}, {transform_indices = @transform_6, window_bounds = array<i64: 8, 128>}]} {
    %c0 = arith.constant 0 : index
    %c0_0 = arith.constant 0 : index
    %c0_1 = arith.constant 0 : index
    %0 = vector.load %arg1[%c0, %c0_0, %c0_1] : memref<8x16x128xbf16, #tpu.memory_space<vmem>>, vector<8x16x128xbf16>
    %1 = arith.extf %0 : vector<8x16x128xbf16> to vector<8x16x128xf32>
    %cst = arith.constant dense<0.000000e+00> : vector<8x128xf32>
    %2 = vector.multi_reduction <add>, %1, %cst [1] : vector<8x16x128xf32> to vector<8x128xf32>
    %cst_2 = arith.constant 1.600000e+01 : f32
    %3 = vector.broadcast %cst_2 : f32 to vector<8x128xf32>
    %4 = arith.divf %2, %3 : vector<8x128xf32>
    %5 = arith.truncf %4 : vector<8x128xf32> to vector<8x128xbf16>
    %c0_3 = arith.constant 0 : index
    %c0_4 = arith.constant 0 : index
    %6 = vector.load %arg8[%c0_3, %c0_4] : memref<8x256xbf16, #tpu.memory_space<vmem>>, vector<8x128xbf16>
    tpu.vector_store %arg8[%c0_3, %c0_4], %5 {strides = array<i32>} : memref<8x256xbf16, #tpu.memory_space<vmem>>, vector<8x128xbf16>,
    %c0_5 = arith.constant 0 : index
    %c0_6 = arith.constant 0 : index
    %7 = vector.load %arg2[%c0_5, %c0_6] : memref<8x128xbf16, #tpu.memory_space<vmem>>, vector<8x128xbf16>
    %c0_7 = arith.constant 0 : index
    %c128 = arith.constant 128 : index
    %8 = vector.load %arg8[%c0_7, %c128] : memref<8x256xbf16, #tpu.memory_space<vmem>>, vector<8x128xbf16>
    tpu.vector_store %arg8[%c0_7, %c128], %7 {strides = array<i32>} : memref<8x256xbf16, #tpu.memory_space<vmem>>, vector<8x128xbf16>,
    %c0_8 = arith.constant 0 : index
    %c0_9 = arith.constant 0 : index
    %9 = vector.load %arg8[%c0_8, %c0_9] : memref<8x256xbf16, #tpu.memory_space<vmem>>, vector<8x256xbf16>
    %c0_10 = arith.constant 0 : index
    %c0_11 = arith.constant 0 : index
    %10 = vector.load %arg3[%c0_10, %c0_11] : memref<256x256xbf16, #tpu.memory_space<vmem>>, vector<256x256xbf16>
    %cst_12 = arith.constant dense<0.000000e+00> : vector<8x256xf32>
    %11 = tpu.matmul %9, %10, %cst_12 {dimension_numbers = #tpu.dot_dimension_numbers<[1], [0], [0], [1], [0, 0, 1, 1], [], []>} : vector<8x256xbf16>, vector<256x256xbf16>, vector<8x256xf32> -> vector<8x256xf32>
    %c0_13 = arith.constant 0 : index
    %c0_14 = arith.constant 0 : index
    %12 = vector.load %arg4[%c0_13, %c0_14] : memref<1x256xf32, #tpu.memory_space<vmem>>, vector<1x256xf32>
    %13 = vector.broadcast %12 : vector<1x256xf32> to vector<8x256xf32>
    %14 = arith.addf %11, %13 : vector<8x256xf32>
    %cst_15 = arith.constant 0.000000e+00 : f32
    %15 = vector.broadcast %cst_15 : f32 to vector<8x256xf32>
    %16 = arith.maximumf %14, %15 : vector<8x256xf32>
    %17 = arith.truncf %16 : vector<8x256xf32> to vector<8x256xbf16>
    %c0_16 = arith.constant 0 : index
    %c0_17 = arith.constant 0 : index
    %18 = vector.load %arg5[%c0_16, %c0_17] : memref<256x128xbf16, #tpu.memory_space<vmem>>, vector<256x128xbf16>
    %cst_18 = arith.constant dense<0.000000e+00> : vector<8x128xf32>
    %19 = tpu.matmul %17, %18, %cst_18 {dimension_numbers = #tpu.dot_dimension_numbers<[1], [0], [0], [1], [0, 0, 1, 1], [], []>} : vector<8x256xbf16>, vector<256x128xbf16>, vector<8x128xf32> -> vector<8x128xf32>
    %c0_19 = arith.constant 0 : index
    %c0_20 = arith.constant 0 : index
    %20 = vector.load %arg6[%c0_19, %c0_20] : memref<1x128xf32, #tpu.memory_space<vmem>>, vector<1x128xf32>
    %21 = vector.broadcast %20 : vector<1x128xf32> to vector<8x128xf32>
    %22 = arith.addf %19, %21 : vector<8x128xf32>
    %c0_21 = arith.constant 0 : index
    %c0_22 = arith.constant 0 : index
    %23 = vector.load %arg7[%c0_21, %c0_22] : memref<8x128xf32, #tpu.memory_space<vmem>>, vector<8x128xf32>
    tpu.vector_store %arg7[%c0_21, %c0_22], %22 {strides = array<i32>} : memref<8x128xf32, #tpu.memory_space<vmem>>, vector<8x128xf32>,
    return
  }
  func.func @transform_0(%arg0: i32) -> (i32, i32, i32) {
    %c0_i32 = arith.constant 0 : i32
    %c0_i32_0 = arith.constant 0 : i32
    %c0_i32_1 = arith.constant 0 : i32
    return %arg0, %c0_i32, %c0_i32_0 : i32, i32, i32
  }
  func.func @transform_1(%arg0: i32) -> (i32, i32) {
    %c0_i32 = arith.constant 0 : i32
    %c0_i32_0 = arith.constant 0 : i32
    return %arg0, %c0_i32 : i32, i32
  }
  func.func @transform_2(%arg0: i32) -> (i32, i32) {
    %c0_i32 = arith.constant 0 : i32
    %c0_i32_0 = arith.constant 0 : i32
    %c0_i32_1 = arith.constant 0 : i32
    return %c0_i32, %c0_i32_0 : i32, i32
  }
  func.func @transform_3(%arg0: i32) -> (i32, i32) {
    %c0_i32 = arith.constant 0 : i32
    %c0_i32_0 = arith.constant 0 : i32
    %c0_i32_1 = arith.constant 0 : i32
    return %c0_i32, %c0_i32_0 : i32, i32
  }
  func.func @transform_4(%arg0: i32) -> (i32, i32) {
    %c0_i32 = arith.constant 0 : i32
    %c0_i32_0 = arith.constant 0 : i32
    %c0_i32_1 = arith.constant 0 : i32
    return %c0_i32, %c0_i32_0 : i32, i32
  }
  func.func @transform_5(%arg0: i32) -> (i32, i32) {
    %c0_i32 = arith.constant 0 : i32
    %c0_i32_0 = arith.constant 0 : i32
    %c0_i32_1 = arith.constant 0 : i32
    return %c0_i32, %c0_i32_0 : i32, i32
  }
  func.func @transform_6(%arg0: i32) -> (i32, i32) {
    %c0_i32 = arith.constant 0 : i32
    %c0_i32_0 = arith.constant 0 : i32
    return %arg0, %c0_i32 : i32, i32
  }
}

</mosaic_0001>

<bundles_post_ra>
// kernel: tpu_custom_call.1
= control target key start
LH: loop header
LB: loop body
LE: loop exit
PB: predicated region body
PF: predicated region fallthrough
CT: control target
= control target key end

     0   :  { %11 = vsyncpa [#allocation4], 0  ;;  %s1235_s0 = inlined_call_operand.hbm [shape: bf16[8,16,128], index: 0, kind: input, shape index: {}]   ;;  %s1236_s1 = inlined_call_operand.hbm [shape: bf16[8,128], index: 1, kind: input, shape index: {}]   ;;  %s1237_s2 = inlined_call_operand.hbm [shape: bf16[256,256], index: 2, kind: input, shape index: {}]   ;;  %s1238_s3 = inlined_call_operand.vmem [shape: f32[1,256], index: 3, kind: input, shape index: {}]   ;;  %s1239_s4 = inlined_call_operand.hbm [shape: bf16[256,128], index: 4, kind: input, shape index: {}]   ;;  %s1240_s5 = inlined_call_operand.vmem [shape: f32[1,128], index: 5, kind: input, shape index: {}]   ;;  %s1241_s6 = inlined_call_operand.hbm [shape: f32[8,128], index: 6, kind: output, shape index: {}]  }
   0x1   :  { %12 = vsyncpa [#allocation7], 0 }
   0x2   :  { %13 = vsyncpa [#allocation10], 0  ;;  %s33_s23 = sshll.u32 %s1236_s1, 4  ;;  %s34_s23 = int_to_ptr.hbm [resolvable:$true] %s33_s23 }
   0x3   :  { %14 = vsyncpa [#allocation5], 0  ;;  %s1091_s24 = smov [#allocation6]   ;;  %s19_s28 = sshll.u32 %s1235_s0, 4  ;;  %s20_s28 = int_to_ptr.hbm [resolvable:$true] %s19_s28 }
   0x4   :  { %s35_s25 = sshll.u32 %s1091_s24, 4  ;;  %s1092_s29 = smov [#allocation3]   ;;  %s36_s25 = int_to_ptr.vmem [resolvable:$true] %s35_s25 }
   0x5   :  { %38 = dma.hbm_to_vmem [thread:$0]  %s34_s23, 64, %s36_s25, [#allocation7]  }
   0x6   :  { %s21_s30 = sshll.u32 %s1092_s29, 4  ;;  %s1093_s7 = smov 64   ;;  %s22_s30 = int_to_ptr.vmem [resolvable:$true] %s21_s30 }
   0x7   :  { %s1094_s8 = smov 4   ;;  %s43_s1 = sshll.u32 %s1237_s2, 4  ;;  %s44_s1 = int_to_ptr.hbm [resolvable:$true] %s43_s1 }
   0x8   :  { %27 = dma.hbm_to_vmem [thread:$0]  %s20_s28, 1024, %s22_s30, [#allocation4], %s1093_s7, %s1093_s7, %s1094_s8  }
   0x9   :  { %s1095_s11 = smov [#allocation8]   ;;  %s58_s0 = sshll.u32 %s1239_s4, 4  ;;  %s59_s0 = int_to_ptr.hbm [resolvable:$true] %s58_s0 }
   0xa   :  { %s45_s12 = sshll.u32 %s1095_s11, 4  ;;  %s1096_s15 = smov 128   ;;  %s46_s12 = int_to_ptr.vmem [resolvable:$true] %s45_s12 }
   0xb   :  { %s1097_s16 = smov 8   ;;  %s1098_s17 = smov [#allocation9]  }
   0xc   :  { %51 = dma.hbm_to_vmem [thread:$0]  %s44_s1, 4096, %s46_s12, [#allocation7], %s1096_s15, %s1096_s15, %s1097_s16  }
   0xd   :  { %s60_s18 = sshll.u32 %s1098_s17, 4  ;;  %s61_s18 = int_to_ptr.vmem [resolvable:$true] %s60_s18 }
   0xe   :  { %66 = dma.hbm_to_vmem [thread:$0]  %s59_s0, 2048, %s61_s18, [#allocation10], %s1093_s7, %s1093_s7, %s1094_s8  }
   0xf   :  { %1083 = dma.done.wait [#allocation4], 1024  }
  0x10   :  { %1084 = vsyncadd [#allocation4], 4294966272 }
  0x11   :  { %1085 = dma.done.wait [#allocation7], 4160  }
  0x12   :  { %1086 = vsyncadd [#allocation7], 4294963136 }
  0x13   :  { %1087 = dma.done.wait [#allocation10], 2048  }
  0x14   :  { %1088 = vsyncadd [#allocation10], 4294965248  ;;  %v729_v0 = vld [vmem:[#allocation8 + $0x70] sm:$0xf]  ;;  %v878_v1 = vld [vmem:[#allocation8 + $0x74] sm:$0xf0] }
  0x15   :  { %v793_v2 = vld [vmem:[#allocation8 + $0xf0] sm:$0xf]  ;;  %v730_v3 = vor.u32 %v878_v1, %v729_v0  ;;  %v894_v4 = vld [vmem:[#allocation8 + $0xf4] sm:$0xf0]  ;;  %v877_v5 = vld [vmem:[#allocation8 + $0x74] sm:$0xf] }
  0x16   :  { %v731_v6 = vld [vmem:[#allocation8 + $0x78] sm:$0xf0]  ;;  %v794_v7 = vor.u32 %v894_v4, %v793_v2  ;;  %v893_v9 = vld [vmem:[#allocation8 + $0xf4] sm:$0xf]  ;;  %v721_v11 = vld [vmem:[#allocation8 + $0x60] sm:$0xf] }
  0x17   :  { %v734_v8 = vor.u32 %v877_v5, %v731_v6  ;;  %v795_v10 = vld [vmem:[#allocation8 + $0xf8] sm:$0xf0]  ;;  %437 = vmatpush.bf16.msra.mxu0 %v730_v3  ;;  %v876_v13 = vld [vmem:[#allocation8 + $0x64] sm:$0xf0]  ;;  %v785_v14 = vld [vmem:[#allocation8 + $0xe0] sm:$0xf] }
  0x18   :  { %v798_v12 = vor.u32 %v893_v9, %v795_v10  ;;  %v892_v15 = vld [vmem:[#allocation8 + $0xe4] sm:$0xf0]  ;;  %450 = vmatpush.bf16.msra.mxu1 %v794_v7  ;;  %v722_v16 = vor.u32 %v876_v13, %v721_v11  ;;  %v875_v18 = vld [vmem:[#allocation8 + $0x64] sm:$0xf]  ;;  %v723_v19 = vld [vmem:[#allocation8 + $0x68] sm:$0xf0] }
  0x19   :  { %463 = vmatpush.bf16.msra.mxu2 %v734_v8  ;;  %v786_v17 = vor.u32 %v892_v15, %v785_v14  ;;  %v891_v20 = vld [vmem:[#allocation8 + $0xe4] sm:$0xf]  ;;  %v726_v21 = vor.u32 %v875_v18, %v723_v19  ;;  %v787_v22 = vld [vmem:[#allocation8 + $0xe8] sm:$0xf0]  ;;  %v713_v23 = vld [vmem:[#allocation8 + $0x50] sm:$0xf] }
  0x1a   :  { %476 = vmatpush.bf16.msra.mxu3 %v798_v12  ;;  %v874_v24 = vld [vmem:[#allocation8 + $0x54] sm:$0xf0]  ;;  %v790_v25 = vor.u32 %v891_v20, %v787_v22  ;;  %v777_v26 = vld [vmem:[#allocation8 + $0xd0] sm:$0xf]  ;;  %v873_v28 = vld [vmem:[#allocation8 + $0x54] sm:$0xf] }
  0x1b   :  { %v890_v27 = vld [vmem:[#allocation8 + $0xd4] sm:$0xf0]  ;;  %438 = vmatpush.bf16.msra.mxu0 %v722_v16  ;;  %v714_v29 = vor.u32 %v874_v24, %v713_v23  ;;  %v715_v30 = vld [vmem:[#allocation8 + $0x58] sm:$0xf0]  ;;  %v889_v31 = vld [vmem:[#allocation8 + $0xd4] sm:$0xf] }
  0x1c   :  { %v779_v32 = vld [vmem:[#allocation8 + $0xd8] sm:$0xf0]  ;;  %451 = vmatpush.bf16.msra.mxu1 %v786_v17  ;;  %v778_v33 = vor.u32 %v890_v27, %v777_v26  ;;  %v718_v34 = vor.u32 %v873_v28, %v715_v30  ;;  %v705_v35 = vld [vmem:[#allocation8 + $0x40] sm:$0xf]  ;;  %v872_v36 = vld [vmem:[#allocation8 + $0x44] sm:$0xf0] }
  0x1d   :  { %464 = vmatpush.bf16.msra.mxu2 %v726_v21  ;;  %v769_v37 = vld [vmem:[#allocation8 + $0xc0] sm:$0xf]  ;;  %v782_v38 = vor.u32 %v889_v31, %v779_v32  ;;  %v888_v39 = vld [vmem:[#allocation8 + $0xc4] sm:$0xf0]  ;;  %v871_v40 = vld [vmem:[#allocation8 + $0x44] sm:$0xf]  ;;  %v706_v44 = vor.u32 %v872_v36, %v705_v35 }
  0x1e   :  { %477 = vmatpush.bf16.msra.mxu3 %v790_v25  ;;  %v707_v41 = vld [vmem:[#allocation8 + $0x48] sm:$0xf0]  ;;  %v887_v42 = vld [vmem:[#allocation8 + $0xc4] sm:$0xf]  ;;  %v697_v45 = vld [vmem:[#allocation8 + $0x30] sm:$0xf]  ;;  %v770_v47 = vor.u32 %v888_v39, %v769_v37 }
  0x1f   :  { %v771_v43 = vld [vmem:[#allocation8 + $0xc8] sm:$0xf0]  ;;  %439 = vmatpush.bf16.msra.mxu0 %v714_v29  ;;  %v870_v46 = vld [vmem:[#allocation8 + $0x34] sm:$0xf0]  ;;  %v710_v48 = vor.u32 %v871_v40, %v707_v41  ;;  %v761_v49 = vld [vmem:[#allocation8 + $0xb0] sm:$0xf] }
  0x20   :  { %452 = vmatpush.bf16.msra.mxu1 %v778_v33  ;;  %v886_v50 = vld [vmem:[#allocation8 + $0xb4] sm:$0xf0]  ;;  %v869_v51 = vld [vmem:[#allocation8 + $0x34] sm:$0xf]  ;;  %v774_v52 = vor.u32 %v887_v42, %v771_v43  ;;  %v699_v53 = vld [vmem:[#allocation8 + $0x38] sm:$0xf0]  ;;  %v698_v61 = vor.u32 %v870_v46, %v697_v45 }
  0x21   :  { %465 = vmatpush.bf16.msra.mxu2 %v718_v34  ;;  %v885_v54 = vld [vmem:[#allocation8 + $0xb4] sm:$0xf]  ;;  %v763_v55 = vld [vmem:[#allocation8 + $0xb8] sm:$0xf0]  ;;  %v689_v56 = vld [vmem:[#allocation8 + $0x20] sm:$0xf]  ;;  %v762_v1 = vor.u32 %v886_v50, %v761_v49  ;;  %v702_v2 = vor.u32 %v869_v51, %v699_v53 }
  0x22   :  { %478 = vmatpush.bf16.msra.mxu3 %v782_v38  ;;  %v868_v57 = vld [vmem:[#allocation8 + $0x24] sm:$0xf0]  ;;  %v1148_v58 = vld [vmem:[#allocation8 + $0xa0] sm:$0xf]  ;;  %v1152_v60 = vld [vmem:[#allocation8 + $0x24] sm:$0xf]  ;;  %v766_v6 = vor.u32 %v885_v54, %v763_v55 }
  0x23   :  { %v1150_v59 = vld [vmem:[#allocation8 + $0xa4] sm:$0xf0]  ;;  %440 = vmatpush.bf16.msra.mxu0 %v706_v44  ;;  %v691_v62 = vld [vmem:[#allocation8 + $0x28] sm:$0xf0]  ;;  %v1154_v63 = vld [vmem:[#allocation8 + $0xa4] sm:$0xf]  ;;  %v690_v13 = vor.u32 %v868_v57, %v689_v56 }
  0x24   :  { %v1156_v0 = vld [vmem:[#allocation8 + $0xa8] sm:$0xf0]  ;;  %453 = vmatpush.bf16.msra.mxu1 %v770_v47  ;;  %v1158_v3 = vld [vmem:[#allocation8 + $0x10] sm:$0xf]  ;;  %v1160_v4 = vld [vmem:[#allocation8 + $0x14] sm:$0xf0]  ;;  %v754_v14 = vor.u32 %v1150_v59, %v1148_v58  ;;  %v694_v15 = vor.u32 %v1152_v60, %v691_v62 }
  0x25   :  { %466 = vmatpush.bf16.msra.mxu2 %v710_v48  ;;  %v1162_v5 = vld [vmem:[#allocation8 + $0x90] sm:$0xf]  ;;  %v1164_v7 = vld [vmem:[#allocation8 + $0x94] sm:$0xf0]  ;;  %v1166_v8 = vld [vmem:[#allocation8 + $0x14] sm:$0xf]  ;;  %v758_v16 = vor.u32 %v1154_v63, %v1156_v0  ;;  %v682_v20 = vor.u32 %v1160_v4, %v1158_v3 }
  0x26   :  { %479 = vmatpush.bf16.msra.mxu3 %v774_v52  ;;  %v1168_v9 = vld [vmem:[#allocation8 + $0x18] sm:$0xf0]  ;;  %v1170_v10 = vld [vmem:[#allocation8 + $0x94] sm:$0xf]  ;;  %v1174_v12 = vld [vmem:[#allocation8] sm:$0xf]  ;;  %v746_v21 = vor.u32 %v1164_v7, %v1162_v5 }
  0x27   :  { %v1172_v11 = vld [vmem:[#allocation8 + $0x98] sm:$0xf0]  ;;  %441 = vmatpush.bf16.msra.mxu0 %v698_v61  ;;  %v1181_v17 = vld [vmem:[#allocation8 + $0x4] sm:$0xf0]  ;;  %v1183_v18 = vld [vmem:[#allocation8 + $0x80] sm:$0xf]  ;;  %v686_v22 = vor.u32 %v1166_v8, %v1168_v9 }
  0x28   :  { %v1185_v19 = vld [vmem:[#allocation8 + $0x84] sm:$0xf0]  ;;  %454 = vmatpush.bf16.msra.mxu1 %v762_v1  ;;  %v1193_v23 = vld [vmem:[#allocation8 + $0x4] sm:$0xf]  ;;  %v1195_v24 = vld [vmem:[#allocation8 + $0x8] sm:$0xf0]  ;;  %v750_v27 = vor.u32 %v1170_v10, %v1172_v11  ;;  %v674_v28 = vor.u32 %v1181_v17, %v1174_v12 }
  0x29   :  { %467 = vmatpush.bf16.msra.mxu2 %v702_v2  ;;  %v1197_v25 = vld [vmem:[#allocation8 + $0x84] sm:$0xf]  ;;  %v1099_v26 = vmov 16.0   ;;  %v738_v29 = vor.u32 %v1185_v19, %v1183_v18  ;;  %v678_v30 = vor.u32 %v1193_v23, %v1195_v24  ;;  %v1207_v31 = vld [vmem:[#allocation8 + $0x88] sm:$0xf0]  ;;  %v912_v32 = vld [vmem:[#allocation3] sm:$0xff]  }
  0x2a   :  { %961 = vrcp.f32 %v1099_v26  ;;  %480 = vmatpush.bf16.msra.mxu3 %v766_v6  ;;  %v943_v33 = vld [vmem:[#allocation3 + $0x8] sm:$0xff]   ;;  %v742_v34 = vor.u32 %v1197_v25, %v1207_v31  ;;  %v913_v35 = vunpack.c.l.bf16 %v912_v32  ;;  %v914_v36 = vunpack.c.h.bf16 %v912_v32  ;;  %v944_v38 = vld [vmem:[#allocation3 + $0x10] sm:$0xff]   ;;  %v945_v39 = vld [vmem:[#allocation3 + $0x18] sm:$0xff]   ;;  %s1100_s20 = smov [#allocation11]   ;;  %s659_s24 = sshll.u32 %s1241_s6, 4  ;;  %s660_s24 = int_to_ptr.hbm [resolvable:$true] %s659_s24 }
  0x2b   :  { %v917_v37 = vunpack.c.l.bf16 %v943_v33  ;;  %v946_v40 = vld [vmem:[#allocation3 + $0x20] sm:$0xff]   ;;  %442 = vmatpush.bf16.msra.mxu0 %v690_v13  ;;  %v918_v41 = vunpack.c.h.bf16 %v943_v33  ;;  %v921_v42 = vunpack.c.l.bf16 %v944_v38  ;;  %v922_v43 = vunpack.c.h.bf16 %v944_v38  ;;  %v947_v45 = vld [vmem:[#allocation3 + $0x28] sm:$0xff]   ;;  %v948_v46 = vld [vmem:[#allocation3 + $0x30] sm:$0xff]   ;;  %s657_s21 = sshll.u32 %s1100_s20, 4  ;;  %s658_s21 = int_to_ptr.vmem [resolvable:$true] %s657_s21 }
  0x2c   :  { %v925_v44 = vunpack.c.l.bf16 %v945_v39  ;;  %v949_v47 = vld [vmem:[#allocation3 + $0x38] sm:$0xff]   ;;  %455 = vmatpush.bf16.msra.mxu1 %v754_v14  ;;  %v926_v48 = vunpack.c.h.bf16 %v945_v39  ;;  %v929_v49 = vunpack.c.l.bf16 %v946_v40  ;;  %v930_v50 = vunpack.c.h.bf16 %v946_v40  ;;  %v229_v9 = vld [vmem:[#allocation6] sm:$0xf] }
  0x2d   :  { %468 = vmatpush.bf16.msra.mxu2 %v694_v15  ;;  %v933_v51 = vunpack.c.l.bf16 %v947_v45  ;;  %v934_v52 = vunpack.c.h.bf16 %v947_v45  ;;  %v937_v53 = vunpack.c.l.bf16 %v948_v46  ;;  %v938_v54 = vunpack.c.h.bf16 %v948_v46  ;;  %230 = vst [vmem:[#allocation2 + $0x4] sm:$0xf] %v229_v9  ;;  %v900_v9 = vld [vmem:[#allocation9 + $0x28] sm:$0xff] }
  0x2e   :  { %481 = vmatpush.bf16.msra.mxu3 %v758_v16  ;;  %v941_v55 = vunpack.c.l.bf16 %v949_v47  ;;  %v942_v57 = vunpack.c.h.bf16 %v949_v47  ;;  %v117_v58 = vadd.f32 %v914_v36, %v913_v35  ;;  %v124_v59 = vadd.f32 %v918_v41, %v917_v37 }
  0x2f   :  { %v131_v60 = vadd.f32 %v922_v43, %v921_v42  ;;  %443 = vmatpush.bf16.msra.mxu0 %v682_v20  ;;  %v138_v61 = vadd.f32 %v926_v48, %v925_v44  ;;  %v145_v62 = vadd.f32 %v930_v50, %v929_v49  ;;  %v152_v63 = vadd.f32 %v934_v52, %v933_v51  ;;  %v902_v51 = vld [vmem:[#allocation9 + $0x38] sm:$0xff] }
  0x30   :  { %v1211_v56 = vpop.eup %961  ;;  %v159_v0 = vadd.f32 %v938_v54, %v937_v53  ;;  %456 = vmatpush.bf16.msra.mxu1 %v746_v21  ;;  %v118_v1 = vrot.slane %v117_v58, 4  ;;  %v125_v2 = vrot.slane %v124_v59, 4  ;;  %v166_v4 = vadd.f32 %v942_v57, %v941_v55  ;;  %v910_v52 = vld [vmem:[#allocation9 + $0x78] sm:$0xff] }
  0x31   :  { %469 = vmatpush.bf16.msra.mxu2 %v686_v22  ;;  %v132_v3 = vrot.slane %v131_v60, 4  ;;  %v139_v5 = vrot.slane %v138_v61, 4  ;;  %v146_v6 = vrot.slane %v145_v62, 4  ;;  %v153_v7 = vrot.slane %v152_v63, 4 }
  0x32   :  { %482 = vmatpush.bf16.msra.mxu3 %v750_v27  ;;  %v160_v8 = vrot.slane %v159_v0, 4  ;;  %v119_v10 = vadd.f32 %v118_v1, %v117_v58  ;;  %v126_v11 = vadd.f32 %v125_v2, %v124_v59  ;;  %v167_v13 = vrot.slane %v166_v4, 4  ;;  %v901_v58 = vld [vmem:[#allocation9 + $0x30] sm:$0xff] }
  0x33   :  { %v133_v12 = vadd.f32 %v132_v3, %v131_v60  ;;  %444 = vmatpush.bf16.msra.mxu0 %v674_v28  ;;  %v140_v14 = vadd.f32 %v139_v5, %v138_v61  ;;  %v147_v15 = vadd.f32 %v146_v6, %v145_v62  ;;  %v154_v16 = vadd.f32 %v153_v7, %v152_v63  ;;  %v909_v60 = vld [vmem:[#allocation9 + $0x70] sm:$0xff] }
  0x34   :  { %v161_v17 = vadd.f32 %v160_v8, %v159_v0  ;;  %457 = vmatpush.bf16.msra.mxu1 %v738_v29  ;;  %v120_v20 = vrot.slane %v119_v10, 2  ;;  %v127_v21 = vrot.slane %v126_v11, 2  ;;  %v168_v23 = vadd.f32 %v167_v13, %v166_v4  ;;  %v908_v13 = vld [vmem:[#allocation9 + $0x68] sm:$0xff] }
  0x35   :  { %470 = vmatpush.bf16.msra.mxu2 %v678_v30  ;;  %v134_v22 = vrot.slane %v133_v12, 2  ;;  %v141_v24 = vrot.slane %v140_v14, 2  ;;  %v148_v26 = vrot.slane %v147_v15, 2  ;;  %v155_v27 = vrot.slane %v154_v16, 2 }
  0x36   :  { %483 = vmatpush.bf16.msra.mxu3 %v742_v34  ;;  %v162_v28 = vrot.slane %v161_v17, 2  ;;  %v121_v32 = vadd.f32 %v120_v20, %v119_v10  ;;  %v169_v33 = vrot.slane %v168_v23, 2  ;;  %v128_v35 = vadd.f32 %v127_v21, %v126_v11 }
  0x37   :  { %v135_v36 = vadd.f32 %v134_v22, %v133_v12  ;;  %v142_v37 = vadd.f32 %v141_v24, %v140_v14  ;;  %v149_v18 = vadd.f32 %v148_v26, %v147_v15  ;;  %v156_v19 = vadd.f32 %v155_v27, %v154_v16  ;;  %625 = vmatpush.bf16.msrb.mxu0 %v902_v51  ;;  %v907_v27 = vld [vmem:[#allocation9 + $0x60] sm:$0xff] }
  0x38   :  { %v163_v29 = vadd.f32 %v162_v28, %v161_v17  ;;  %v170_v30 = vadd.f32 %v169_v33, %v168_v23  ;;  %v174_v38 = vmul.f32 16.0, %v1211_v56  ;;  %v122_v39 = vrot.slane %v121_v32, 1  ;;  %638 = vmatpush.bf16.msrb.mxu1 %v910_v52  ;;  %v899_v23 = vld [vmem:[#allocation9 + $0x20] sm:$0xff] }
  0x39   :  { %v129_v40 = vrot.slane %v128_v35, 1  ;;  %v136_v41 = vrot.slane %v135_v36, 1  ;;  %v143_v25 = vrot.slane %v142_v37, 1  ;;  %v150_v31 = vrot.slane %v149_v18, 1 }
  0x3a   :  { %v157_v34 = vrot.slane %v156_v19, 1  ;;  %v164_v42 = vrot.slane %v163_v29, 1  ;;  %v171_v43 = vrot.slane %v170_v30, 1  ;;  %v175_v44 = vsub.f32 1.0, %v174_v38 }
  0x3b   :  { %v123_v45 = vadd.f32 %v122_v39, %v121_v32  ;;  %vm178_vm0 = vweird.f32 %v1211_v56  ;;  %v130_v47 = vadd.f32 %v129_v40, %v128_v35  ;;  %v137_v48 = vadd.f32 %v136_v41, %v135_v36  ;;  %626 = vmatpush.bf16.msrb.mxu0 %v901_v58  ;;  %v898_v36 = vld [vmem:[#allocation9 + $0x18] sm:$0xff] }
  0x3c   :  { %v176_v46 = vmul.f32 %v1211_v56, %v175_v44  ;;  %v144_v49 = vadd.f32 %v143_v25, %v142_v37  ;;  %v151_v50 = vadd.f32 %v150_v31, %v149_v18  ;;  %v158_v53 = vadd.f32 %v157_v34, %v156_v19  ;;  %639 = vmatpush.bf16.msrb.mxu1 %v909_v60  ;;  %v906_v25 = vld [vmem:[#allocation9 + $0x58] sm:$0xff]  ;;  %v896_v31 = vld [vmem:[#allocation9 + $0x8] sm:$0xff]  ;;  %v905_v34 = vld [vmem:[#allocation9 + $0x50] sm:$0xff] }
  0x3d   :  { %v165_v54 = vadd.f32 %v164_v42, %v163_v29  ;;  %v172_v55 = vadd.f32 %v171_v43, %v170_v30  ;;  %vm212_vm1 = vcmask 1041409   ;;  %vm214_vm2 = vcmask 1042434   ;;  %v897_v29 = vld [vmem:[#allocation9 + $0x10] sm:$0xff]  ;;  %v895_v42 = vld [vmem:[#allocation9] sm:$0xff]  ;;  %v904_v43 = vld [vmem:[#allocation9 + $0x48] sm:$0xff] }
  0x3e   :  { %v177_v57 = vadd.f32 %v1211_v56, %v176_v46  ;;  %vm216_vm3 = vcmask 1043459   ;;  %vm218_vm4 = vcmask 1044484   ;;  %vm220_vm5 = vcmask 1045509   ;;  %v903_v44 = vld [vmem:[#allocation9 + $0x40] sm:$0xff] }
  0x3f   :  { %627 = vmatpush.bf16.msrb.mxu0 %v900_v9  ;;  %vm222_vm6 = vcmask 1046534   ;;  %vm224_vm7 = vcmask 1047559  }
  0x40   :  { %v179_v59 = vsel %vm178_vm0, %v1211_v56, %v177_v57  ;;  %640 = vmatpush.bf16.msrb.mxu1 %v908_v13 }
  0x41   :  { %v180_v61 = vmul.f32 %v179_v59, %v123_v45  ;;  %v181_v62 = vmul.f32 %v179_v59, %v130_v47  ;;  %v182_v63 = vmul.f32 %v179_v59, %v137_v48  ;;  %v183_v0 = vmul.f32 %v179_v59, %v144_v49  ;;  %v264_v45 = vld [vmem:[%s1238_s3] sm:$0x3] }
  0x42   :  { %v184_v1 = vmul.f32 %v179_v59, %v151_v50  ;;  %v185_v2 = vmul.f32 %v179_v59, %v158_v53  ;;  %v186_v3 = vmul.f32 %v179_v59, %v165_v54  ;;  %v187_v4 = vmul.f32 %v179_v59, %v172_v55 }
  0x43   :  { %v188_v5 = vpack.c.bf16 %v180_v61, %v180_v61  ;;  %v189_v6 = vpack.c.bf16 %v181_v62, %v181_v62  ;;  %v190_v7 = vpack.c.bf16 %v182_v63, %v182_v63  ;;  %v191_v8 = vpack.c.bf16 %v183_v0, %v183_v0  ;;  %628 = vmatpush.bf16.msrb.mxu0 %v899_v23 }
  0x44   :  { %v192_v10 = vpack.c.bf16 %v184_v1, %v184_v1  ;;  %v193_v11 = vpack.c.bf16 %v185_v2, %v185_v2  ;;  %v194_v56 = vpack.c.bf16 %v186_v3, %v186_v3  ;;  %v195_v12 = vpack.c.bf16 %v187_v4, %v187_v4  ;;  %641 = vmatpush.bf16.msrb.mxu1 %v907_v27  ;;  %v960_v1 = vld [vmem:[%s1240_s5] ss:$0 sm:$0xff] }
  0x45   :  { %v204_v14 = vunpack.c.l.b16 %v188_v5  ;;  %v205_v15 = vunpack.c.l.b16 %v189_v6  ;;  %v206_v16 = vunpack.c.l.b16 %v190_v7  ;;  %v207_v17 = vunpack.c.l.b16 %v191_v8 }
  0x46   :  { %v208_v20 = vunpack.c.l.b16 %v192_v10  ;;  %v209_v21 = vunpack.c.l.b16 %v193_v11  ;;  %v210_v24 = vunpack.c.l.b16 %v194_v56  ;;  %v211_v28 = vunpack.c.l.b16 %v195_v12 }
  0x47   :  { %v213_v22 = vsel %vm212_vm1, %v205_v15, %v204_v14  ;;  %629 = vmatpush.bf16.msrb.mxu0 %v898_v36  ;;  %v266_v46 = vperm.slane %v264_v45, 0  ;;  %v267_v51 = vperm.slane %v264_v45, 1 }
  0x48   :  { %v215_v26 = vsel %vm214_vm2, %v206_v16, %v213_v22  ;;  %642 = vmatpush.bf16.msrb.mxu1 %v906_v25 }
  0x49   :  { %v217_v32 = vsel %vm216_vm3, %v207_v17, %v215_v26 }
  0x4a   :  { %v219_v33 = vsel %vm218_vm4, %v208_v20, %v217_v32 }
  0x4b   :  { %v221_v35 = vsel %vm220_vm5, %v209_v21, %v219_v33  ;;  %630 = vmatpush.bf16.msrb.mxu0 %v897_v29 }
  0x4c   :  { %v223_v37 = vsel %vm222_vm6, %v210_v24, %v221_v35  ;;  %643 = vmatpush.bf16.msrb.mxu1 %v905_v34 }
  0x4d   :  { %v225_v18 = vsel %vm224_vm7, %v211_v28, %v223_v37 }
  0x4e   :  { %v226_v19 = vpack.c.b16 %v225_v18, %v225_v18 }
  0x4f   :  { %631 = vmatpush.bf16.msrb.mxu0 %v896_v31 }
  0x50   :  { %228 = vst [vmem:[#allocation2] sm:$0xf] %v226_v19  ;;  %644 = vmatpush.bf16.msrb.mxu1 %v904_v43 }
  0x53   :  { %632 = vmatpush.bf16.msrb.mxu0 %v895_v42 }
  0x54   :  { %645 = vmatpush.bf16.msrb.mxu1 %v903_v44 }
  0x57   :  { %v231_v30 = vld [vmem:[#allocation2] sm:$0xff] }
  0x58   :  { %v271_v38 = vunpack.c.l.b16 %v231_v30  ;;  %v272_v39 = vunpack.c.h.b16 %v231_v30 }
  0x5a   :  { %v273_v40 = vpack.c.b16 %v271_v38, %v271_v38  ;;  %v274_v41 = vpack.c.b16 %v272_v39, %v272_v39 }
  0x5c   :  { %445 = vmatmul.bf16.vlgmr.msra.gmra.mxu0 %v273_v40  ;;  %458 = vmatmul.bf16.vlgmr.msra.gmra.mxu1 %v274_v41 }
  0x5d   :  { %471 = vmatmul.bf16.vlgmr.msra.gmra.mxu2 %v273_v40  ;;  %484 = vmatmul.bf16.vlgmr.msra.gmra.mxu3 %v274_v41 }
  0xd9   :  { %v446_v47 = vpop.f32.mrf.mxu0  ;;  %v459_v48 = vpop.f32.mrf.mxu1 }
  0xda   :  { %v447_v49 = vadd.f32 %v446_v47, %v266_v46 }
  0xdc   :  { %v460_v50 = vadd.f32 %v459_v48, %v447_v49 }
  0xde   :  { %v489_v52 = vmax.f32 %v460_v50, 0.0 }
  0xe0   :  { %v491_v53 = vpack.c.bf16 %v489_v52, %v489_v52  ;;  %v472_v54 = vpop.f32.mrf.mxu2  ;;  %v485_v55 = vpop.f32.mrf.mxu3 }
  0xe1   :  { %v473_v57 = vadd.f32 %v472_v54, %v267_v51  ;;  %v448_v58 = vpop.f32.mrf.mxu0  ;;  %v461_v59 = vpop.f32.mrf.mxu1 }
  0xe2   :  { %633 = vmatmul.bf16.vlgmr.msrb.gmra.mxu0 %v491_v53 }
  0xe3   :  { %v486_v60 = vadd.f32 %v485_v55, %v473_v57 }
  0xe5   :  { %v490_v61 = vmax.f32 %v486_v60, 0.0 }
  0xe7   :  { %v492_v62 = vpack.c.bf16 %v490_v61, %v490_v61 }
  0xe8   :  { %v474_v63 = vpop.f32.mrf.mxu2  ;;  %v487_v0 = vpop.f32.mrf.mxu3 }
  0xe9   :  { %646 = vmatmul.bf16.vlgmr.msrb.gmra.mxu1 %v492_v62 }
 0x15f   :  { %v634_v2 = vpop.f32.mrf.mxu0 }
 0x160   :  { %v635_v3 = vadd.f32 %v960_v1, %v634_v2 }
 0x166   :  { %v647_v4 = vpop.f32.mrf.mxu1 }
 0x167   :  { %v648_v5 = vadd.f32 %v647_v4, %v635_v3  ;;  %v636_v6 = vpop.f32.mrf.mxu0 }
 0x169   :  { %651 = vst [vmem:[#allocation11] sm:$0xff] %v648_v5 }
 0x16a   :  { %662 = dma.vmem_to_hbm [thread:$0]  %s658_s21, 128, %s660_s24, [#allocation5]  }
 0x16e   :  { %v649_v7 = vpop.f32.mrf.mxu1 }
 0x16f   :  { %1089 = dma.done.wait [#allocation5], 128  }
 0x170   :  { %1090 = vsyncadd [#allocation5], 4294967168 }
 0x171   :  { %667 = vsyncpa [#allocation4], 1 }
 0x172   :  { %668 = vsyncpa [#allocation7], 1 }
 0x173   :  { %669 = vsyncpa [#allocation10], 1 }
 0x174   :  { %670 = vsyncpa [#allocation5], 1 }

</bundles_post_ra>
